<compile_context>
chip_gen: v7x
topology: tpu7x:2x2x1
jax: 0.10.0
libtpu: 0.0.40
codegen_flags: <defaults>
</compile_context>

<pallas_src>
import functools

import jax
import jax.numpy as jnp
from jax.experimental import pallas as pl
from jax.experimental.pallas import tpu as pltpu

KERNEL_SIZE = 25  # fixed in DLModel.__init__


def _dlinear_kernel(x_ref, w_ref, b_ref, o_ref):
    # x_ref: (L, TN)  time on sublanes, fused B*C*V rows on lanes
    # w_ref: (P, L)   fused seasonal+trend weight
    # b_ref: (P, 1)   fused bias
    # o_ref: (P, TN)
    out = jnp.dot(w_ref[...], x_ref[...], preferred_element_type=jnp.float32)
    o_ref[...] = (out + b_ref[...]).astype(o_ref.dtype)


def build_moving_avg_matrix(seq_len, kernel_size):
    """A[t, s] = (1/K) * #{k in [-pad, pad] : clip(t + k, 0, L-1) == s}.

    Exactly reproduces AvgPool1d(K, stride=1) over the edge-replicated series."""
    pad = (kernel_size - 1) // 2
    idx = jnp.arange(seq_len)[:, None] + jnp.arange(-pad, pad + 1)[None, :]
    idx = jnp.clip(idx, 0, seq_len - 1)                        # (L, K)
    A = jax.nn.one_hot(idx, seq_len, dtype=jnp.float32).sum(axis=1) / kernel_size
    return A                                                   # (L, L)


def _round_up(x, m):
    return ((x + m - 1) // m) * m


@functools.partial(jax.jit, static_argnames=("kernel_size", "lane_tile"))
def dlinear_forward(x, Ws, bs, Wt, bt, kernel_size=KERNEL_SIZE, lane_tile=2048):
    """x: (B, seq_len, channels, num_vars).
    Ws, Wt: (pred_len, seq_len)  (PyTorch nn.Linear weight layout); bs, bt: (pred_len,).
    Returns (B, pred_len, channels, num_vars)."""
    B, L, C, V = x.shape
    P = Ws.shape[0]
    N = B * C * V
    lane_tile = _round_up(max(lane_tile, 128), 128)

    # ---- trace-time fusion (removes 2 of 3 matmuls and 4 operand DMAs) ----
    A = build_moving_avg_matrix(L, kernel_size)                # (L, L)
    # trend = A @ r (per length-L series r); fused weight applies both branches at once.
    W_fused = (Ws + jnp.dot(Wt - Ws, A,
                            precision=jax.lax.Precision.HIGHEST)).astype(x.dtype)
    b_fused = (bs + bt).astype(jnp.float32)[:, None]           # (P, 1)

    # ---- lane-dense layout: time on sublanes, B*C*V on lanes ----
    # TODO(synk): for very large inputs this transpose is an extra HBM round-trip;
    # it could be fused into the producer instead of being done here.
    xt = jnp.transpose(x, (1, 0, 2, 3)).reshape(L, N)          # (L, N)

    if N <= lane_tile:
        Np = _round_up(N, 128)                                 # lane-dense single step
        TN = Np
    else:
        TN = lane_tile
        Np = _round_up(N, TN)
    if Np != N:
        xt = jnp.pad(xt, ((0, 0), (0, Np - N)))
    grid = (Np // TN,)

    cost = pl.CostEstimate(
        flops=2 * P * L * Np,
        transcendentals=0,
        bytes_accessed=x.dtype.itemsize * (L * Np + P * Np + P * L) + 4 * P,
    )

    out = pl.pallas_call(
        _dlinear_kernel,
        out_shape=jax.ShapeDtypeStruct((P, Np), x.dtype),
        grid=grid,
        in_specs=[
            pl.BlockSpec((L, TN), lambda i: (0, i)),           # x^T lane tile
            pl.BlockSpec((P, L), lambda i: (0, 0)),            # fused weight (resident)
            pl.BlockSpec((P, 1), lambda i: (0, 0)),            # fused bias   (resident)
        ],
        out_specs=pl.BlockSpec((P, TN), lambda i: (0, i)),
        compiler_params=pltpu.CompilerParams(
            dimension_semantics=("parallel",)),
        cost_estimate=cost,
    )(xt, W_fused, b_fused)

    out = out[:, :N].reshape(P, B, C, V)
    return jnp.transpose(out, (1, 0, 2, 3))                    # (B, pred_len, C, num_vars)


# ----- plain-JAX reference mirroring the PyTorch module (for verification) -----
def reference_forward(x, Ws, bs, Wt, bt, kernel_size=KERNEL_SIZE):
    B, L, C, V = x.shape
    pad = (kernel_size - 1) // 2
    outs = []
    for v in range(V):
        xs = x[..., v]                                          # (B, L, C)
        front = jnp.repeat(xs[:, 0:1, :], pad, axis=1)
        end = jnp.repeat(xs[:, -1:, :], pad, axis=1)
        xp = jnp.concatenate([front, xs, end], axis=1)          # (B, L+2*pad, C)
        mm = jnp.stack([xp[:, t:t + kernel_size, :].mean(axis=1) for t in range(L)],
                       axis=1)                                  # (B, L, C)
        res = xs - mm
        s_i = jnp.transpose(res, (0, 2, 1))                     # (B, C, L)
        t_i = jnp.transpose(mm, (0, 2, 1))
        so = s_i @ Ws.T + bs
        to = t_i @ Wt.T + bt
        outs.append(jnp.transpose(so + to, (0, 2, 1)))          # (B, P, C)
    return jnp.stack(outs, axis=-1)                             # (B, P, C, V)


if __name__ == "__main__":
    # configs: src_seq_len=32, trg_seq_len=16, sensors(channels)=4, individual=False
    B, SEQ_LEN, PRED_LEN, CHANNELS, NUM_VARS = 2, 32, 16, 4, 3

    key = jax.random.PRNGKey(0)
    kx, kw1, kb1, kw2, kb2 = jax.random.split(key, 5)

    x = jax.random.normal(kx, (B, SEQ_LEN, CHANNELS, NUM_VARS), dtype=jnp.float32)
    # Deterministic "Linear" parameters (PyTorch layout: weight (P, L), bias (P,))
    Ws = jax.random.normal(kw1, (PRED_LEN, SEQ_LEN), dtype=jnp.float32) * 0.02
    bs = jax.random.normal(kb1, (PRED_LEN,), dtype=jnp.float32) * 0.02
    Wt = jax.random.normal(kw2, (PRED_LEN, SEQ_LEN), dtype=jnp.float32) * 0.02
    bt = jax.random.normal(kb2, (PRED_LEN,), dtype=jnp.float32) * 0.02

    out = dlinear_forward(x, Ws, bs, Wt, bt)
    out = jax.block_until_ready(out)

    ref = reference_forward(x, Ws, bs, Wt, bt)
    assert out.shape == (B, PRED_LEN, CHANNELS, NUM_VARS), out.shape
    assert jnp.allclose(out, ref, rtol=1e-4, atol=1e-4), \
        f"max abs diff {jnp.max(jnp.abs(out - ref))}"

    # TODO(synk): configs.individual=True (per-channel Linear weights) not implemented;
    # it would fuse a (C, P, L) weight tensor with a per-channel contraction in the kernel.
    print("KERNEL_OK")
</pallas_src>

<mosaic_0001>
module attributes {stable_mosaic.version = 11 : i64} {
  func.func @_dlinear_kernel(%arg0: i32, %arg1: memref<32x128xf32, #tpu.memory_space<vmem>>, %arg2: memref<16x32xf32, #tpu.memory_space<vmem>>, %arg3: memref<16x1xf32, #tpu.memory_space<vmem>>, %arg4: memref<16x128xf32, #tpu.memory_space<vmem>>) attributes {dimension_semantics = [#tpu.dimension_semantics<parallel>], iteration_bounds = array<i64: 1>, scalar_prefetch = 0 : i64, scratch_operands = 0 : i64, tpu.core_type = #tpu.core_type<tc>, window_params = [{transform_indices = @transform_0, window_bounds = array<i64: 32, 128>}, {pipeline_mode = #tpu.pipeline_mode<synchronous>, transform_indices = @transform_1, window_bounds = array<i64: 16, 32>}, {pipeline_mode = #tpu.pipeline_mode<synchronous>, transform_indices = @transform_2, window_bounds = array<i64: 16, 1>}, {transform_indices = @transform_3, window_bounds = array<i64: 16, 128>}]} {
    %c0 = arith.constant 0 : index
    %c0_0 = arith.constant 0 : index
    %0 = vector.load %arg2[%c0, %c0_0] : memref<16x32xf32, #tpu.memory_space<vmem>>, vector<16x32xf32>
    %c0_1 = arith.constant 0 : index
    %c0_2 = arith.constant 0 : index
    %1 = vector.load %arg1[%c0_1, %c0_2] : memref<32x128xf32, #tpu.memory_space<vmem>>, vector<32x128xf32>
    %cst = arith.constant dense<0.000000e+00> : vector<16x128xf32>
    %2 = tpu.matmul %0, %1, %cst {dimension_numbers = #tpu.dot_dimension_numbers<[1], [0], [0], [1], [0, 0, 1, 1], [], []>} : vector<16x32xf32>, vector<32x128xf32>, vector<16x128xf32> -> vector<16x128xf32>
    %c0_3 = arith.constant 0 : index
    %c0_4 = arith.constant 0 : index
    %3 = vector.load %arg3[%c0_3, %c0_4] : memref<16x1xf32, #tpu.memory_space<vmem>>, vector<16x1xf32>
    %4 = vector.broadcast %3 : vector<16x1xf32> to vector<16x128xf32>
    %5 = arith.addf %2, %4 : vector<16x128xf32>
    %c0_5 = arith.constant 0 : index
    %c0_6 = arith.constant 0 : index
    %6 = vector.load %arg4[%c0_5, %c0_6] : memref<16x128xf32, #tpu.memory_space<vmem>>, vector<16x128xf32>
    tpu.vector_store %arg4[%c0_5, %c0_6], %5 {strides = array<i32>} : memref<16x128xf32, #tpu.memory_space<vmem>>, vector<16x128xf32>,
    return
  }
  func.func @transform_0(%arg0: i32) -> (i32, i32) {
    %c0_i32 = arith.constant 0 : i32
    %c0_i32_0 = arith.constant 0 : i32
    return %c0_i32, %arg0 : i32, i32
  }
  func.func @transform_1(%arg0: i32) -> (i32, i32) {
    %c0_i32 = arith.constant 0 : i32
    %c0_i32_0 = arith.constant 0 : i32
    %c0_i32_1 = arith.constant 0 : i32
    return %c0_i32, %c0_i32_0 : i32, i32
  }
  func.func @transform_2(%arg0: i32) -> (i32, i32) {
    %c0_i32 = arith.constant 0 : i32
    %c0_i32_0 = arith.constant 0 : i32
    %c0_i32_1 = arith.constant 0 : i32
    return %c0_i32, %c0_i32_0 : i32, i32
  }
  func.func @transform_3(%arg0: i32) -> (i32, i32) {
    %c0_i32 = arith.constant 0 : i32
    %c0_i32_0 = arith.constant 0 : i32
    return %c0_i32, %arg0 : i32, i32
  }
}

</mosaic_0001>

<bundles_post_ra>
// kernel: dlinear_forward.1
= control target key start
LH: loop header
LB: loop body
LE: loop exit
PB: predicated region body
PF: predicated region fallthrough
CT: control target
= control target key end

     0   :  { %vm32_vm0 = vcmask 261120   ;;  %v149_v3 = vmov 0   ;;  %s202_s0 = inlined_call_operand.vmem [shape: f32[32,128], index: 0, kind: input, shape index: {}]   ;;  %s203_s1 = inlined_call_operand.vmem [shape: f32[16,32], index: 1, kind: input, shape index: {}]   ;;  %s204_s2 = inlined_call_operand.vmem [shape: f32[16,1], index: 2, kind: input, shape index: {}]   ;;  %s205_s3 = inlined_call_operand.vmem [shape: f32[16,128], index: 3, kind: output, shape index: {}]  }
   0x1   :  { %v16_v0 = vld [vmem:[%s202_s0] sm:$0xff]  ;;  %v17_v1 = vld [vmem:[%s202_s0 + $0x8] sm:$0xff]  ;;  %v18_v2 = vld [vmem:[%s202_s0 + $0x10] sm:$0xff]  ;;  %148 = vset.pattern.permute.xlu0 %v149_v3 }
   0x2   :  { %v139_v4 = vpack.c.bf16 %v17_v1, %v16_v0  ;;  %v19_v5 = vld [vmem:[%s202_s0 + $0x18] sm:$0xff]  ;;  %v14_v6 = vld [vmem:[%s203_s1] sm:$0xff]  ;;  %v21_v9 = vld [vmem:[%s204_s2 + $0x8] sm:$0xff] }
   0x3   :  { %v143_v7 = vpack.c.bf16 %v19_v5, %v18_v2  ;;  %136 = vmatprep.mubr.msk.f32.mxu0 %vm32_vm0, %v14_v6  ;;  %v20_v8 = vld [vmem:[%s204_s2] sm:$0xff]  ;;  %v15_v10 = vld [vmem:[%s203_s1 + $0x8] sm:$0xff] }
   0x4   :  { %140 = vmatprep.subr.bf16.mxu0 %v139_v4  ;;  %24 = vperm.xlu0 %148, %v20_v8  }
   0x5   :  { %142 = vmatpush3.bf16.msra.mxu0 %v139_v4 }
   0x6   :  { %144 = vmatprep.subr.bf16.mxu0 %v143_v7 }
   0x8   :  { %29 = vperm.xlu0 %148, %v21_v9  }
   0x9   :  { %146 = vmatpush3.bf16.msra.mxu0 %v143_v7 }
   0xc   :  { %137 = vmatmul.mubr.msk.f32.vlgmr.msra.gmra.mrb[0].mxu0 %vm32_vm0, %v15_v10 }
  0x83   :  { %v25_v11 = vpop.permute.xlu0 %24 }
  0x87   :  { %v30_v12 = vpop.permute.xlu0 %29 }
  0xdf   :  { %v138_v13 = vpop.f32.mrb[0].mxu0 }
  0xe0   :  { %v111_v14 = vadd.f32 %v138_v13, %v30_v12  ;;  %v105_v15 = vpop.f32.mrb[1].mxu0 }
  0xe1   :  { %v106_v16 = vadd.f32 %v105_v15, %v25_v11 }
  0xe2   :  { %115 = vst [vmem:[%s205_s3 + $0x8] sm:$0xff] %v111_v14 }
  0xe3   :  { %114 = vst [vmem:[%s205_s3] sm:$0xff] %v106_v16 }

</bundles_post_ra>
